<compile_context>
chip_gen: v5e
topology: v5e:2x2
jax: 0.10.0
libtpu: 0.0.40
codegen_flags: <defaults>
</compile_context>

<pallas_src>
from typing import NamedTuple

import jax
import jax.numpy as jnp
from jax.experimental import pallas as pl
from jax.experimental.pallas import tpu as pltpu

LANE = 128     # last-dim tiles must be multiples of 128 (lane width)
SUBLANE = 16   # bf16 packs 16 rows per vreg; keep batch tiles 16-aligned


def _cdiv(a, b):
    return -(-a // b)


def _round_up(x, m):
    return _cdiv(x, m) * m


def _pad2d(a, rows, cols):
    r, c = a.shape
    if r == rows and c == cols:
        return a                     # no-op: no extra HBM pass
    return jnp.pad(a, ((0, rows - r), (0, cols - c)))


# --------------------------------------------------------------------------
# One-time weight packing (pad to lane multiples + cast to MXU dtype).
# --------------------------------------------------------------------------
class PackedMLP(NamedTuple):
    w1: jax.Array
    b1: jax.Array
    w2: jax.Array
    b2: jax.Array
    w3: jax.Array
    b3: jax.Array
    dims: tuple  # (input_dim, hidden1, hidden2, output_dim), unpadded


def prepack_params(params, *, compute_dtype=jnp.bfloat16):
    """Pad + cast the weights once at init.

    Weights are stored [in_features, out_features] (transposed vs nn.Linear),
    biases [1, out_features].  Zero padding is mathematically exact for
    Linear/ReLU.  Biases stay f32 so bias+ReLU run on the f32 accumulator.
    """
    w1, b1, w2, b2, w3, b3 = params
    D, H1 = w1.shape
    H2 = w2.shape[1]
    O = w3.shape[1]
    D_p, H1_p, H2_p, O_p = (_round_up(d, LANE) for d in (D, H1, H2, O))
    return PackedMLP(
        w1=_pad2d(w1, D_p, H1_p).astype(compute_dtype),
        b1=_pad2d(b1.reshape(1, -1), 1, H1_p).astype(jnp.float32),
        w2=_pad2d(w2, H1_p, H2_p).astype(compute_dtype),
        b2=_pad2d(b2.reshape(1, -1), 1, H2_p).astype(jnp.float32),
        w3=_pad2d(w3, H2_p, O_p).astype(compute_dtype),
        b3=_pad2d(b3.reshape(1, -1), 1, O_p).astype(jnp.float32),
        dims=(D, H1, H2, O),
    )


# --------------------------------------------------------------------------
# Kernel
# --------------------------------------------------------------------------
def mlp_kernel(x_ref, w1_ref, b1_ref, w2_ref, b2_ref, w3_ref, b3_ref, o_ref):
    # Cast the activation tile to the MXU dtype in-kernel (no wrapper cast pass).
    x = x_ref[...].astype(w1_ref.dtype)
    # Layer 1: Linear (+ Dropout == identity at inference) + ReLU.
    h = jnp.dot(x, w1_ref[...], preferred_element_type=jnp.float32)
    h = jnp.maximum(h + b1_ref[...], 0.0)          # bias + ReLU on f32 accumulator
    # Layer 2: Linear (+ Dropout == identity) + ReLU.
    h = jnp.dot(h.astype(w2_ref.dtype), w2_ref[...],
                preferred_element_type=jnp.float32)
    h = jnp.maximum(h + b2_ref[...], 0.0)
    # Layer 3: Linear.
    h = jnp.dot(h.astype(w3_ref.dtype), w3_ref[...],
                preferred_element_type=jnp.float32)
    o_ref[...] = (h + b3_ref[...]).astype(o_ref.dtype)
    # TODO(synk): training-mode dropout; v5e sub-tile MXU/VPU interleave.


# --------------------------------------------------------------------------
# Feature detection / hardware queries (cached; happy path compiles once).
# --------------------------------------------------------------------------
_SINGLE_BUFFER_OK = None


def _single_buffer_weights_supported():
    """One-time probe: does this Pallas build accept pipeline_mode=Buffered(1)
    for grid-invariant blocks?  Probe failures only disable single buffering;
    real-build errors in mlp_forward are never masked by a retry."""
    global _SINGLE_BUFFER_OK
    if _SINGLE_BUFFER_OK is None:
        def _probe(a_ref, o_ref):
            o_ref[...] = a_ref[...] + 1.0

        try:
            fn = pl.pallas_call(
                _probe,
                out_shape=jax.ShapeDtypeStruct((8, LANE), jnp.float32),
                grid_spec=pltpu.PrefetchScalarGridSpec(
                    num_scalar_prefetch=0,
                    grid=(2,),
                    in_specs=[pl.BlockSpec((8, LANE), lambda i: (0, 0),
                                           pipeline_mode=pl.Buffered(1))],
                    out_specs=pl.BlockSpec((8, LANE), lambda i: (0, 0)),
                ),
            )
            jax.block_until_ready(fn(jnp.zeros((8, LANE), jnp.float32)))
            _SINGLE_BUFFER_OK = True
        except Exception:
            _SINGLE_BUFFER_OK = False
    return _SINGLE_BUFFER_OK


def _vmem_capacity_bytes():
    try:
        return int(pltpu.get_tpu_info().vmem_capacity_bytes)
    except Exception:
        return 64 * 1024 * 1024   # conservative: v7x per-core VMEM


# --------------------------------------------------------------------------
# Forward
# --------------------------------------------------------------------------
def mlp_forward(x, packed: PackedMLP, *, block_b=None, out_dtype=None):
    """Fused 3-layer MLP forward.  x: [B, input_dim]; packed: prepack_params()."""
    w1_p, b1_p, w2_p, b2_p, w3_p, b3_p = (packed.w1, packed.b1, packed.w2,
                                          packed.b2, packed.w3, packed.b3)
    D, H1, H2, O = packed.dims
    B = x.shape[0]
    assert x.shape[1] == D, (x.shape, D)
    out_dtype = x.dtype if out_dtype is None else out_dtype

    D_p, H1_p = w1_p.shape
    H2_p = w2_p.shape[1]
    O_p = w3_p.shape[1]

    single_buffer = _single_buffer_weights_supported()
    vmem_cap = _vmem_capacity_bytes()
    if block_b is None:
        # ~512-row tiles on 128 MiB chips (v5e/v6e), 256 on 64 MiB (v7x).
        block_b = 512 if vmem_cap >= (100 << 20) else 256

    c_size = jnp.dtype(w1_p.dtype).itemsize
    x_size = jnp.dtype(x.dtype).itemsize
    o_size = jnp.dtype(out_dtype).itemsize
    weight_bytes = (D_p * H1_p + H1_p * H2_p + H2_p * O_p) * c_size
    bias_bytes = (H1_p + H2_p + O_p) * 4
    weight_buf = 1 if single_buffer else 2
    weight_vmem = weight_buf * (weight_bytes + bias_bytes)

    # Per-row VMEM: double-buffered x/out tiles + rough f32/bf16 intermediates.
    act_row = 2 * (D_p * x_size + O_p * o_size)
    inter_row = D_p * c_size + (H1_p + H2_p + O_p) * (4 + c_size)
    row_bytes = act_row + inter_row

    budget = int(0.80 * vmem_cap)
    if weight_vmem + SUBLANE * row_bytes > budget:
        # TODO(synk): K/N-tiled streaming-weight path (grid over hidden dims +
        # f32 accumulator scratch + pl.when init/finalize) for very wide MLPs.
        raise ValueError(
            f"resident-weight MLP kernel needs >= {weight_vmem + SUBLANE * row_bytes} "
            f"bytes of VMEM but budget is {budget}; streaming path not implemented")

    # Batch tiling: balanced tiles to minimize padded rows; >= 2 tiles whenever
    # B > SUBLANE so both v7x TensorCores get work; cap rows by remaining VMEM.
    bb_cap = max(SUBLANE,
                 ((budget - weight_vmem) // row_bytes) // SUBLANE * SUBLANE)
    n_tiles = _cdiv(B, max(SUBLANE, min(block_b, bb_cap)))
    if B > SUBLANE:
        n_tiles = max(n_tiles, 2)
    bb = min(_round_up(_cdiv(B, n_tiles), SUBLANE), bb_cap)
    grid_b = _cdiv(B, bb)
    B_p = grid_b * bb

    # Only x is touched per call: zero-pad rows/features if needed (exact math);
    # no dtype cast here -- the kernel casts to the MXU dtype on the fly.
    x_p = _pad2d(x, B_p, D_p)

    cost = pl.CostEstimate(
        flops=2 * B_p * (D_p * H1_p + H1_p * H2_p + H2_p * O_p),
        transcendentals=0,
        bytes_accessed=int(B_p * D_p * x_size + weight_bytes + bias_bytes
                           + B_p * O_p * o_size),
    )
    vmem_limit = min(vmem_cap,
                     max(32 * 1024 * 1024,
                         int(1.2 * (weight_vmem + bb * row_bytes))))

    if single_buffer:
        # Grid-invariant blocks: one VMEM copy instead of two.
        const_spec = lambda s: pl.BlockSpec(s, lambda i: (0, 0),
                                            pipeline_mode=pl.Buffered(1))
    else:
        const_spec = lambda s: pl.BlockSpec(s, lambda i: (0, 0))

    out_p = pl.pallas_call(
        mlp_kernel,
        out_shape=jax.ShapeDtypeStruct((B_p, O_p), out_dtype),
        grid_spec=pltpu.PrefetchScalarGridSpec(
            num_scalar_prefetch=0,
            grid=(grid_b,),
            in_specs=[
                pl.BlockSpec((bb, D_p), lambda i: (i, 0)),     # x batch tile
                const_spec((D_p, H1_p)), const_spec((1, H1_p)),
                const_spec((H1_p, H2_p)), const_spec((1, H2_p)),
                const_spec((H2_p, O_p)), const_spec((1, O_p)),
            ],
            out_specs=pl.BlockSpec((bb, O_p), lambda i: (i, 0)),
        ),
        compiler_params=pltpu.CompilerParams(
            dimension_semantics=("parallel",),    # megacore / v7x 2-TC split
            vmem_limit_bytes=vmem_limit,
        ),
        cost_estimate=cost,
    )(x_p, w1_p, b1_p, w2_p, b2_p, w3_p, b3_p)

    return out_p[:B, :O]


# --------------------------------------------------------------------------
# Init + pure-JAX reference
# --------------------------------------------------------------------------
def init_params(key, input_dim, output_dim, dtype=jnp.float32):
    """PyTorch-style Linear init; weights stored [in, out], biases [1, out]."""
    h1, h2 = input_dim // 2, input_dim // 4
    dims = [(input_dim, h1), (h1, h2), (h2, output_dim)]
    params = []
    for fan_in, fan_out in dims:
        key, kw, kb = jax.random.split(key, 3)
        bound = 1.0 / (fan_in ** 0.5)
        params.append(jax.random.uniform(kw, (fan_in, fan_out), dtype, -bound, bound))
        params.append(jax.random.uniform(kb, (1, fan_out), dtype, -bound, bound))
    return tuple(params)


def mlp_reference(x, params, compute_dtype=None):
    """Pure-JAX reference; optionally mirrors the kernel's operand casts."""
    w1, b1, w2, b2, w3, b3 = params
    cast = (lambda a: a.astype(compute_dtype)) if compute_dtype is not None \
        else (lambda a: a)
    h = jnp.dot(cast(x), cast(w1), preferred_element_type=jnp.float32) + b1
    h = jnp.maximum(h, 0.0)
    h = jnp.dot(cast(h), cast(w2), preferred_element_type=jnp.float32) + b2
    h = jnp.maximum(h, 0.0)
    return jnp.dot(cast(h), cast(w3), preferred_element_type=jnp.float32) + b3


if __name__ == "__main__":
    key = jax.random.PRNGKey(0)
    input_dim, output_dim = 32, 8

    k_x1, k_x2, k_p = jax.random.split(key, 3)
    params = init_params(k_p, input_dim, output_dim)
    packed = prepack_params(params)      # one-time pad + bf16 cast of the weights

    # B=16: single tile; B=40: exercises batch padding + the 2-tile parallel grid.
    for B, kx in ((16, k_x1), (40, k_x2)):
        x = jax.random.normal(kx, (B, input_dim), jnp.float32)
        out = jax.block_until_ready(mlp_forward(x, packed))
        assert out.shape == (B, output_dim)
        assert out.dtype == x.dtype

        # Tight check vs a reference applying the same bf16 operand casts ...
        ref_cast = mlp_reference(x, params, compute_dtype=jnp.bfloat16)
        assert jnp.allclose(out, ref_cast, atol=2e-3, rtol=2e-3), \
            float(jnp.max(jnp.abs(out - ref_cast)))
        # ... plus a loose check against the full-f32 reference.
        ref_f32 = mlp_reference(x, params)
        assert jnp.allclose(out, ref_f32, atol=5e-2, rtol=5e-2), \
            float(jnp.max(jnp.abs(out - ref_f32)))

    print("KERNEL_OK")
</pallas_src>

<mosaic_0001>
module attributes {stable_mosaic.version = 11 : i64} {
  func.func @_probe(%arg0: i32, %arg1: memref<8x128xf32, #tpu.memory_space<vmem>>, %arg2: memref<8x128xf32, #tpu.memory_space<vmem>>) attributes {dimension_semantics = [#tpu.dimension_semantics<arbitrary>], iteration_bounds = array<i64: 2>, scalar_prefetch = 0 : i64, scratch_operands = 0 : i64, tpu.core_type = #tpu.core_type<tc>, window_params = [{pipeline_mode = #tpu.pipeline_mode<synchronous>, transform_indices = @transform_0, window_bounds = array<i64: 8, 128>}, {pipeline_mode = #tpu.pipeline_mode<synchronous>, transform_indices = @transform_1, window_bounds = array<i64: 8, 128>}]} {
    %c0 = arith.constant 0 : index
    %c0_0 = arith.constant 0 : index
    %0 = vector.load %arg1[%c0, %c0_0] : memref<8x128xf32, #tpu.memory_space<vmem>>, vector<8x128xf32>
    %cst = arith.constant 1.000000e+00 : f32
    %1 = vector.broadcast %cst : f32 to vector<8x128xf32>
    %2 = arith.addf %0, %1 : vector<8x128xf32>
    %c0_1 = arith.constant 0 : index
    %c0_2 = arith.constant 0 : index
    %3 = vector.load %arg2[%c0_1, %c0_2] : memref<8x128xf32, #tpu.memory_space<vmem>>, vector<8x128xf32>
    tpu.vector_store %arg2[%c0_1, %c0_2], %2 {strides = array<i32>} : memref<8x128xf32, #tpu.memory_space<vmem>>, vector<8x128xf32>,
    return
  }
  func.func @transform_0(%arg0: i32) -> (i32, i32) {
    %c0_i32 = arith.constant 0 : i32
    %c0_i32_0 = arith.constant 0 : i32
    %c0_i32_1 = arith.constant 0 : i32
    return %c0_i32, %c0_i32_0 : i32, i32
  }
  func.func @transform_1(%arg0: i32) -> (i32, i32) {
    %c0_i32 = arith.constant 0 : i32
    %c0_i32_0 = arith.constant 0 : i32
    %c0_i32_1 = arith.constant 0 : i32
    return %c0_i32, %c0_i32_0 : i32, i32
  }
}

module attributes {stable_mosaic.version = 11 : i64} {
  func.func @mlp_kernel(%arg0: i32, %arg1: memref<16x128xf32, #tpu.memory_space<vmem>>, %arg2: memref<128x128xbf16, #tpu.memory_space<vmem>>, %arg3: memref<1x128xf32, #tpu.memory_space<vmem>>, %arg4: memref<128x128xbf16, #tpu.memory_space<vmem>>, %arg5: memref<1x128xf32, #tpu.memory_space<vmem>>, %arg6: memref<128x128xbf16, #tpu.memory_space<vmem>>, %arg7: memref<1x128xf32, #tpu.memory_space<vmem>>, %arg8: memref<16x128xf32, #tpu.memory_space<vmem>>) attributes {dimension_semantics = [#tpu.dimension_semantics<parallel>], iteration_bounds = array<i64: 1>, scalar_prefetch = 0 : i64, scratch_operands = 0 : i64, tpu.core_type = #tpu.core_type<tc>, window_params = [{transform_indices = @transform_0, window_bounds = array<i64: 16, 128>}, {pipeline_mode = #tpu.pipeline_mode<synchronous>, transform_indices = @transform_1, window_bounds = array<i64: 128, 128>}, {pipeline_mode = #tpu.pipeline_mode<synchronous>, transform_indices = @transform_2, window_bounds = array<i64: 1, 128>}, {pipeline_mode = #tpu.pipeline_mode<synchronous>, transform_indices = @transform_3, window_bounds = array<i64: 128, 128>}, {pipeline_mode = #tpu.pipeline_mode<synchronous>, transform_indices = @transform_4, window_bounds = array<i64: 1, 128>}, {pipeline_mode = #tpu.pipeline_mode<synchronous>, transform_indices = @transform_5, window_bounds = array<i64: 128, 128>}, {pipeline_mode = #tpu.pipeline_mode<synchronous>, transform_indices = @transform_6, window_bounds = array<i64: 1, 128>}, {transform_indices = @transform_7, window_bounds = array<i64: 16, 128>}]} {
    %c0 = arith.constant 0 : index
    %c0_0 = arith.constant 0 : index
    %0 = vector.load %arg1[%c0, %c0_0] : memref<16x128xf32, #tpu.memory_space<vmem>>, vector<16x128xf32>
    %1 = arith.truncf %0 : vector<16x128xf32> to vector<16x128xbf16>
    %c0_1 = arith.constant 0 : index
    %c0_2 = arith.constant 0 : index
    %2 = vector.load %arg2[%c0_1, %c0_2] : memref<128x128xbf16, #tpu.memory_space<vmem>>, vector<128x128xbf16>
    %cst = arith.constant dense<0.000000e+00> : vector<16x128xf32>
    %3 = tpu.matmul %1, %2, %cst {dimension_numbers = #tpu.dot_dimension_numbers<[1], [0], [0], [1], [0, 0, 1, 1], [], []>} : vector<16x128xbf16>, vector<128x128xbf16>, vector<16x128xf32> -> vector<16x128xf32>
    %c0_3 = arith.constant 0 : index
    %c0_4 = arith.constant 0 : index
    %4 = vector.load %arg3[%c0_3, %c0_4] : memref<1x128xf32, #tpu.memory_space<vmem>>, vector<1x128xf32>
    %5 = vector.broadcast %4 : vector<1x128xf32> to vector<16x128xf32>
    %6 = arith.addf %3, %5 : vector<16x128xf32>
    %cst_5 = arith.constant 0.000000e+00 : f32
    %7 = vector.broadcast %cst_5 : f32 to vector<16x128xf32>
    %8 = arith.maximumf %6, %7 : vector<16x128xf32>
    %9 = arith.truncf %8 : vector<16x128xf32> to vector<16x128xbf16>
    %c0_6 = arith.constant 0 : index
    %c0_7 = arith.constant 0 : index
    %10 = vector.load %arg4[%c0_6, %c0_7] : memref<128x128xbf16, #tpu.memory_space<vmem>>, vector<128x128xbf16>
    %cst_8 = arith.constant dense<0.000000e+00> : vector<16x128xf32>
    %11 = tpu.matmul %9, %10, %cst_8 {dimension_numbers = #tpu.dot_dimension_numbers<[1], [0], [0], [1], [0, 0, 1, 1], [], []>} : vector<16x128xbf16>, vector<128x128xbf16>, vector<16x128xf32> -> vector<16x128xf32>
    %c0_9 = arith.constant 0 : index
    %c0_10 = arith.constant 0 : index
    %12 = vector.load %arg5[%c0_9, %c0_10] : memref<1x128xf32, #tpu.memory_space<vmem>>, vector<1x128xf32>
    %13 = vector.broadcast %12 : vector<1x128xf32> to vector<16x128xf32>
    %14 = arith.addf %11, %13 : vector<16x128xf32>
    %cst_11 = arith.constant 0.000000e+00 : f32
    %15 = vector.broadcast %cst_11 : f32 to vector<16x128xf32>
    %16 = arith.maximumf %14, %15 : vector<16x128xf32>
    %17 = arith.truncf %16 : vector<16x128xf32> to vector<16x128xbf16>
    %c0_12 = arith.constant 0 : index
    %c0_13 = arith.constant 0 : index
    %18 = vector.load %arg6[%c0_12, %c0_13] : memref<128x128xbf16, #tpu.memory_space<vmem>>, vector<128x128xbf16>
    %cst_14 = arith.constant dense<0.000000e+00> : vector<16x128xf32>
    %19 = tpu.matmul %17, %18, %cst_14 {dimension_numbers = #tpu.dot_dimension_numbers<[1], [0], [0], [1], [0, 0, 1, 1], [], []>} : vector<16x128xbf16>, vector<128x128xbf16>, vector<16x128xf32> -> vector<16x128xf32>
    %c0_15 = arith.constant 0 : index
    %c0_16 = arith.constant 0 : index
    %20 = vector.load %arg7[%c0_15, %c0_16] : memref<1x128xf32, #tpu.memory_space<vmem>>, vector<1x128xf32>
    %21 = vector.broadcast %20 : vector<1x128xf32> to vector<16x128xf32>
    %22 = arith.addf %19, %21 : vector<16x128xf32>
    %c0_17 = arith.constant 0 : index
    %c0_18 = arith.constant 0 : index
    %23 = vector.load %arg8[%c0_17, %c0_18] : memref<16x128xf32, #tpu.memory_space<vmem>>, vector<16x128xf32>
    tpu.vector_store %arg8[%c0_17, %c0_18], %22 {strides = array<i32>} : memref<16x128xf32, #tpu.memory_space<vmem>>, vector<16x128xf32>,
    return
  }
  func.func @transform_0(%arg0: i32) -> (i32, i32) {
    %c0_i32 = arith.constant 0 : i32
    %c0_i32_0 = arith.constant 0 : i32
    return %arg0, %c0_i32 : i32, i32
  }
  func.func @transform_1(%arg0: i32) -> (i32, i32) {
    %c0_i32 = arith.constant 0 : i32
    %c0_i32_0 = arith.constant 0 : i32
    %c0_i32_1 = arith.constant 0 : i32
    return %c0_i32, %c0_i32_0 : i32, i32
  }
  func.func @transform_2(%arg0: i32) -> (i32, i32) {
    %c0_i32 = arith.constant 0 : i32
    %c0_i32_0 = arith.constant 0 : i32
    %c0_i32_1 = arith.constant 0 : i32
    return %c0_i32, %c0_i32_0 : i32, i32
  }
  func.func @transform_3(%arg0: i32) -> (i32, i32) {
    %c0_i32 = arith.constant 0 : i32
    %c0_i32_0 = arith.constant 0 : i32
    %c0_i32_1 = arith.constant 0 : i32
    return %c0_i32, %c0_i32_0 : i32, i32
  }
  func.func @transform_4(%arg0: i32) -> (i32, i32) {
    %c0_i32 = arith.constant 0 : i32
    %c0_i32_0 = arith.constant 0 : i32
    %c0_i32_1 = arith.constant 0 : i32
    return %c0_i32, %c0_i32_0 : i32, i32
  }
  func.func @transform_5(%arg0: i32) -> (i32, i32) {
    %c0_i32 = arith.constant 0 : i32
    %c0_i32_0 = arith.constant 0 : i32
    %c0_i32_1 = arith.constant 0 : i32
    return %c0_i32, %c0_i32_0 : i32, i32
  }
  func.func @transform_6(%arg0: i32) -> (i32, i32) {
    %c0_i32 = arith.constant 0 : i32
    %c0_i32_0 = arith.constant 0 : i32
    %c0_i32_1 = arith.constant 0 : i32
    return %c0_i32, %c0_i32_0 : i32, i32
  }
  func.func @transform_7(%arg0: i32) -> (i32, i32) {
    %c0_i32 = arith.constant 0 : i32
    %c0_i32_0 = arith.constant 0 : i32
    return %arg0, %c0_i32 : i32, i32
  }
}

</mosaic_0001>

<bundles_post_ra>
// kernel: tpu_custom_call.1
= control target key start
LH: loop header
LB: loop body
LE: loop exit
PB: predicated region body
PF: predicated region fallthrough
CT: control target
= control target key end

     0   :  { %6 = vsyncpa [#allocation3], 0  ;;  %s287_s0 = inlined_call_operand.hbm [shape: f32[8,128], index: 0, kind: input, shape index: {}]   ;;  %s288_s1 = inlined_call_operand.hbm [shape: f32[8,128], index: 1, kind: output, shape index: {}]  }
   0x1   :  { %7 = vsyncpa [#allocation4], 0  ;;  %s270_s6 = smov 0  }
   0x2 LB: > { %s149_s7 = sadd.s32 4294967295, %s256_s6   ;;  %p150_p0 = scmp.ge.s32.totalorder %s256_s6, 1  ;;  %s256_s6 = sphi %s270_s6, %s13_s6  }
   0x3   : > { %p60_p1 = scmp.lt.s32.totalorder %s256_s6, 3  ;;  %s72_s10 = sshll.u32 %s287_s0, 4  ;;  %s73_s10 = int_to_ptr.hbm [resolvable:$true] %s72_s10 }
   0x4   : > { %p170_p3 = scmp.eq.s32.totalorder %s149_s7, 0  ;;  %s258_s11 = smov [#allocation2]  }
   0x5   : > { %p61_p2 = pnand %p150_p0, %p60_p1  ;;  %s74_s12 = sshll.u32 %s258_s11, 4  ;;  %s75_s12 = int_to_ptr.vmem [resolvable:$true] %s74_s12 }
   0x7   : > { %p166_p4 = pneg %p61_p2  ;;  %87 = sbr.rel (%p61_p2) target bundleno = 20 (0x14), region = 24 }
   0x9   : > { %p167_p5 = pnand %p170_p3, %p166_p4 }
   0xb   : > { %169 = dma.hbm_to_vmem [thread:$0]  (!%p167_p5), %s73_s10, 128, %s75_s12, [#allocation3]  }
   0xc   : > { %247 = dma.done.wait (%p170_p3), [#allocation3], 128  }
   0xd   : > { %249 = vsyncadd (%p170_p3), [#allocation3], 4294967168  ;;  %s259_s13 = smov [#allocation5]   ;;  %s109_s17 = sshll.u32 %s288_s1, 4  ;;  %v98_v0 = vld [vmem:[#allocation2] sm:$0xff]  ;;  %s110_s17 = int_to_ptr.hbm [resolvable:$true] %s109_s17 }
   0xe   : > { %s107_s14 = sshll.u32 %s259_s13, 4  ;;  %p172_p6 = scmp.eq.s32.totalorder %s149_s7, 1  ;;  %v99_v1 = vadd.f32 1.0, %v98_v0  ;;  %s108_s14 = int_to_ptr.vmem [resolvable:$true] %s107_s14 }
  0x10   : > { %100 = vst [vmem:[#allocation5] sm:$0xff] %v99_v1 }
  0x11   : > { %163 = dma.vmem_to_hbm [thread:$0]  (%p172_p6), %s108_s14, 128, %s110_s17, [#allocation4]  }
  0x12   : > { %251 = dma.done.wait (%p172_p6), [#allocation4], 128  }
  0x13   : > { %253 = vsyncadd (%p172_p6), [#allocation4], 4294967168 }
  0x14 PF: > { %s13_s6 = sadd.s32 1, %s256_s6  }
  0x15   : > { %p10_p7 = scmp.ge.s32.totalorder %s13_s6, 4  }
  0x17   :  { %12 = sbr.rel (!%p10_p7) target bundleno = 2 (0x2), region = 53 }
  0x1c   :  { %123 = vsyncpa [#allocation3], 1 }
  0x1d   :  { %125 = vsyncpa [#allocation3 + $0x1], 1 }
  0x1e   :  { %126 = vsyncpa [#allocation4], 1 }
  0x1f   :  { %128 = vsyncpa [#allocation4 + $0x1], 1 }

// kernel: tpu_custom_call.1
= control target key start
LH: loop header
LB: loop body
LE: loop exit
PB: predicated region body
PF: predicated region fallthrough
CT: control target
= control target key end

     0   :  { %12 = vsyncpa [#allocation3], 0  ;;  %s707_s0 = inlined_call_operand.hbm [shape: f32[16,128], index: 0, kind: input, shape index: {}]   ;;  %s708_s1 = inlined_call_operand.hbm [shape: bf16[128,128], index: 1, kind: input, shape index: {}]   ;;  %s709_s2 = inlined_call_operand.vmem [shape: f32[1,128], index: 2, kind: input, shape index: {}]   ;;  %s710_s3 = inlined_call_operand.hbm [shape: bf16[128,128], index: 3, kind: input, shape index: {}]   ;;  %s711_s4 = inlined_call_operand.vmem [shape: f32[1,128], index: 4, kind: input, shape index: {}]   ;;  %s712_s5 = inlined_call_operand.hbm [shape: bf16[128,128], index: 5, kind: input, shape index: {}]   ;;  %s713_s6 = inlined_call_operand.vmem [shape: f32[1,128], index: 6, kind: input, shape index: {}]   ;;  %s714_s7 = inlined_call_operand.hbm [shape: f32[16,128], index: 7, kind: output, shape index: {}]  }
   0x1   :  { %13 = vsyncpa [#allocation6], 0 }
   0x2   :  { %14 = vsyncpa [#allocation9], 0  ;;  %s33_s26 = sshll.u32 %s708_s1, 4  ;;  %s34_s26 = int_to_ptr.hbm [resolvable:$true] %s33_s26 }
   0x3   :  { %15 = vsyncpa [#allocation4], 0  ;;  %s628_s27 = smov [#allocation5]   ;;  %s20_s8 = sshll.u32 %s707_s0, 4  ;;  %s21_s8 = int_to_ptr.hbm [resolvable:$true] %s20_s8 }
   0x4   :  { %s35_s28 = sshll.u32 %s628_s27, 4  ;;  %s629_s9 = smov 64   ;;  %s36_s28 = int_to_ptr.vmem [resolvable:$true] %s35_s28 }
   0x5   :  { %s630_s10 = smov 4   ;;  %s631_s11 = smov [#allocation2]  }
   0x6   :  { %41 = dma.hbm_to_vmem [thread:$0]  %s34_s26, 1024, %s36_s28, [#allocation6], %s629_s9, %s629_s9, %s630_s10  }
   0x7   :  { %s22_s12 = sshll.u32 %s631_s11, 4  ;;  %s632_s13 = smov 128   ;;  %s23_s12 = int_to_ptr.vmem [resolvable:$true] %s22_s12 }
   0x8   :  { %s633_s14 = smov 8   ;;  %s48_s16 = sshll.u32 %s710_s3, 4  ;;  %s49_s16 = int_to_ptr.hbm [resolvable:$true] %s48_s16 }
   0x9   :  { %28 = dma.hbm_to_vmem [thread:$0]  %s21_s8, 256, %s23_s12, [#allocation3], %s632_s13, %s632_s13, %s633_s14  }
   0xa   :  { %s634_s17 = smov [#allocation7]   ;;  %s63_s20 = sshll.u32 %s712_s5, 4  ;;  %s64_s20 = int_to_ptr.hbm [resolvable:$true] %s63_s20 }
   0xb   :  { %s50_s0 = sshll.u32 %s634_s17, 4  ;;  %s635_s21 = smov [#allocation8]   ;;  %s51_s0 = int_to_ptr.vmem [resolvable:$true] %s50_s0 }
   0xc   :  { %56 = dma.hbm_to_vmem [thread:$0]  %s49_s16, 1024, %s51_s0, [#allocation6], %s629_s9, %s629_s9, %s630_s10  }
   0xd   :  { %s65_s22 = sshll.u32 %s635_s21, 4  ;;  %s66_s22 = int_to_ptr.vmem [resolvable:$true] %s65_s22 }
   0xe   :  { %71 = dma.hbm_to_vmem [thread:$0]  %s64_s20, 1024, %s66_s22, [#allocation9], %s629_s9, %s629_s9, %s630_s10  }
   0xf   :  { %620 = dma.done.wait [#allocation3], 256  }
  0x10   :  { %621 = vsyncadd [#allocation3], 4294967040 }
  0x11   :  { %622 = dma.done.wait [#allocation6], 2048  }
  0x12   :  { %623 = vsyncadd [#allocation6], 4294965248 }
  0x13   :  { %624 = dma.done.wait [#allocation9], 1024  }
  0x14   :  { %625 = vsyncadd [#allocation9], 4294966272  ;;  %v471_v0 = vld [vmem:[#allocation5 + $0x38] sm:$0xff]  ;;  %v470_v1 = vld [vmem:[#allocation5 + $0x30] sm:$0xff]  ;;  %s636_s26 = smov [#allocation10]  }
  0x15   :  { %161 = vmatpush.bf16.msra.mxu0 %v471_v0  ;;  %v479_v2 = vld [vmem:[#allocation7 + $0x38] sm:$0xff]  ;;  %v478_v3 = vld [vmem:[#allocation7 + $0x30] sm:$0xff]  ;;  %v469_v4 = vld [vmem:[#allocation5 + $0x28] sm:$0xff]  ;;  %s351_s27 = sshll.u32 %s636_s26, 4  ;;  %s352_s27 = int_to_ptr.vmem [resolvable:$true] %s351_s27 }
  0x16   :  { %246 = vmatpush.bf16.msra.mxu1 %v479_v2  ;;  %v477_v5 = vld [vmem:[#allocation7 + $0x28] sm:$0xff]  ;;  %v468_v6 = vld [vmem:[#allocation5 + $0x20] sm:$0xff]  ;;  %v467_v8 = vld [vmem:[#allocation5 + $0x18] sm:$0xff] }
  0x17   :  { %v476_v7 = vld [vmem:[#allocation7 + $0x20] sm:$0xff]  ;;  %v466_v9 = vld [vmem:[#allocation5 + $0x10] sm:$0xff]  ;;  %v465_v10 = vld [vmem:[#allocation5 + $0x8] sm:$0xff] }
  0x18   :  { %v464_v11 = vld [vmem:[#allocation5] sm:$0xff]  ;;  %v90_v12 = vld [vmem:[#allocation2] sm:$0xff]  ;;  %v91_v13 = vld [vmem:[#allocation2 + $0x8] sm:$0xff] }
  0x19   :  { %162 = vmatpush.bf16.msra.mxu0 %v470_v1  ;;  %v92_v14 = vpack.c.bf16 %v91_v13, %v90_v12  ;;  %v475_v15 = vld [vmem:[#allocation7 + $0x18] sm:$0xff]  ;;  %v474_v16 = vld [vmem:[#allocation7 + $0x10] sm:$0xff]  ;;  %v473_v17 = vld [vmem:[#allocation7 + $0x8] sm:$0xff] }
  0x1a   :  { %247 = vmatpush.bf16.msra.mxu1 %v478_v3  ;;  %v472_v18 = vld [vmem:[#allocation7] sm:$0xff]  ;;  %v487_v19 = vld [vmem:[#allocation8 + $0x38] sm:$0xff]  ;;  %v486_v20 = vld [vmem:[#allocation8 + $0x30] sm:$0xff] }
  0x1b   :  { %331 = vmatpush.bf16.msra.mxu2 %v487_v19  ;;  %v485_v21 = vld [vmem:[#allocation8 + $0x28] sm:$0xff]  ;;  %v484_v22 = vld [vmem:[#allocation8 + $0x20] sm:$0xff]  ;;  %v497_v24 = vld [vmem:[%s709_s2] ss:$0 sm:$0xff] }
  0x1c   :  { %v483_v31 = vld [vmem:[#allocation8 + $0x18] sm:$0xff]  ;;  %v482_v32 = vld [vmem:[#allocation8 + $0x10] sm:$0xff]  ;;  %v481_v33 = vld [vmem:[#allocation8 + $0x8] sm:$0xff] }
  0x1d   :  { %163 = vmatpush.bf16.msra.mxu0 %v469_v4  ;;  %v480_v34 = vld [vmem:[#allocation8] sm:$0xff]  ;;  %v498_v36 = vld [vmem:[%s711_s4] ss:$0 sm:$0xff]  ;;  %s353_s4 = sshll.u32 %s714_s7, 4  ;;  %s354_s4 = int_to_ptr.hbm [resolvable:$true] %s353_s4 }
  0x1e   :  { %248 = vmatpush.bf16.msra.mxu1 %v477_v5  ;;  %v499_v43 = vld [vmem:[%s713_s6] ss:$0 sm:$0xff] }
  0x1f   :  { %332 = vmatpush.bf16.msra.mxu2 %v486_v20 }
  0x21   :  { %164 = vmatpush.bf16.msra.mxu0 %v468_v6 }
  0x22   :  { %249 = vmatpush.bf16.msra.mxu1 %v476_v7 }
  0x23   :  { %333 = vmatpush.bf16.msra.mxu2 %v485_v21 }
  0x25   :  { %165 = vmatpush.bf16.msra.mxu0 %v467_v8 }
  0x26   :  { %250 = vmatpush.bf16.msra.mxu1 %v475_v15 }
  0x27   :  { %334 = vmatpush.bf16.msra.mxu2 %v484_v22 }
  0x29   :  { %166 = vmatpush.bf16.msra.mxu0 %v466_v9 }
  0x2a   :  { %251 = vmatpush.bf16.msra.mxu1 %v474_v16 }
  0x2b   :  { %335 = vmatpush.bf16.msra.mxu2 %v483_v31 }
  0x2d   :  { %167 = vmatpush.bf16.msra.mxu0 %v465_v10 }
  0x2e   :  { %252 = vmatpush.bf16.msra.mxu1 %v473_v17 }
  0x2f   :  { %336 = vmatpush.bf16.msra.mxu2 %v482_v32 }
  0x31   :  { %168 = vmatpush.bf16.msra.mxu0 %v464_v11 }
  0x32   :  { %253 = vmatpush.bf16.msra.mxu1 %v472_v18 }
  0x33   :  { %337 = vmatpush.bf16.msra.mxu2 %v481_v33 }
  0x34   :  { %169 = vmatmul.bf16.vlgmr.msra.gmra.mxu0 %v92_v14 }
  0x37   :  { %338 = vmatpush.bf16.msra.mxu2 %v480_v34 }
  0xb1   :  { %v170_v23 = vpop.f32.mrf.mxu0 }
  0xb2   :  { %v171_v25 = vadd.f32 %v497_v24, %v170_v23 }
  0xb4   :  { %v175_v28 = vmax.f32 %v171_v25, 0.0 }
  0xb9   :  { %v172_v26 = vpop.f32.mrf.mxu0 }
  0xba   :  { %v173_v27 = vadd.f32 %v497_v24, %v172_v26 }
  0xbc   :  { %v176_v29 = vmax.f32 %v173_v27, 0.0 }
  0xbe   :  { %v177_v30 = vpack.c.bf16 %v176_v29, %v175_v28 }
  0xc0   :  { %254 = vmatmul.bf16.vlgmr.msra.gmra.mxu1 %v177_v30 }
 0x13d   :  { %v255_v35 = vpop.f32.mrf.mxu1 }
 0x13e   :  { %v256_v37 = vadd.f32 %v498_v36, %v255_v35 }
 0x140   :  { %v260_v40 = vmax.f32 %v256_v37, 0.0 }
 0x145   :  { %v257_v38 = vpop.f32.mrf.mxu1 }
 0x146   :  { %v258_v39 = vadd.f32 %v498_v36, %v257_v38 }
 0x148   :  { %v261_v41 = vmax.f32 %v258_v39, 0.0 }
 0x14a   :  { %v262_v42 = vpack.c.bf16 %v261_v41, %v260_v40 }
 0x14c   :  { %339 = vmatmul.bf16.vlgmr.msra.gmra.mxu2 %v262_v42 }
 0x1cf   :  { %v340_v44 = vpop.f32.mrf.mxu2 }
 0x1d0   :  { %v341_v45 = vadd.f32 %v499_v43, %v340_v44 }
 0x1d2   :  { %345 = vst [vmem:[#allocation10] sm:$0xff] %v341_v45 }
 0x1d7   :  { %v342_v46 = vpop.f32.mrf.mxu2 }
 0x1d8   :  { %v343_v47 = vadd.f32 %v499_v43, %v342_v46 }
 0x1da   :  { %346 = vst [vmem:[#allocation10 + $0x8] sm:$0xff] %v343_v47 }
 0x1db   :  { %359 = dma.vmem_to_hbm [thread:$0]  %s352_s27, 256, %s354_s4, [#allocation4], %s632_s13, %s632_s13, %s633_s14  }
 0x1dc   :  { %626 = dma.done.wait [#allocation4], 256  }
 0x1dd   :  { %627 = vsyncadd [#allocation4], 4294967040 }
 0x1de   :  { %364 = vsyncpa [#allocation3], 1 }
 0x1df   :  { %365 = vsyncpa [#allocation6], 1 }
 0x1e0   :  { %366 = vsyncpa [#allocation9], 1 }
 0x1e1   :  { %367 = vsyncpa [#allocation4], 1 }

</bundles_post_ra>
